<compile_context>
chip_gen: v5e
topology: v5e:2x2
jax: 0.10.0
libtpu: 0.0.40
codegen_flags: <defaults>
</compile_context>

<pallas_src>
from functools import partial

import jax
import jax.numpy as jnp
from jax.experimental import pallas as pl
from jax.experimental.pallas import tpu as pltpu


# ---------------------------------------------------------------------------
# Fused kernel: one grid step == one batch tile (BT samples).
#   x_ref   : (BT, C, HW)   lane axis = HW (lane-dense for HW % 128 == 0)
#   w1t_ref : (C, R)  = W1.T   (PyTorch Conv2d(C, R, 1) weight is (R, C))
#   b1_ref  : (1, R)
#   w2t_ref : (R, C)  = W2.T   (PyTorch Conv2d(R, C, 1) weight is (C, R))
#   b2_ref  : (1, C)
#   o_ref   : (BT, C, HW)
# ---------------------------------------------------------------------------
def _se_fused_kernel(x_ref, w1t_ref, b1_ref, w2t_ref, b2_ref, o_ref, *, inv_hw):
    x = x_ref[...]
    # Global average pool over spatial (lane reduction), f32 accumulation.
    pooled = jnp.sum(x.astype(jnp.float32), axis=-1) * inv_hw          # (BT, C)
    # FC1 + ReLU and FC2 as tiny MXU matmuls (keeps VPU/XLU slots free).
    h = jnp.dot(pooled, w1t_ref[...], preferred_element_type=jnp.float32)
    h = jnp.maximum(h + b1_ref[...], 0.0)                              # (BT, R)
    z = jnp.dot(h, w2t_ref[...], preferred_element_type=jnp.float32)
    z = z + b2_ref[...]                                                # (BT, C)
    s = jax.nn.sigmoid(z)                                              # EUP exp
    # Channel-wise rescale (broadcast (BT, C, 1) over the HW lane axis).
    o_ref[...] = (x * s.astype(x.dtype)[:, :, None]).astype(o_ref.dtype)


# ---------------------------------------------------------------------------
# Large-slab fallback, pass 1: HW-tiled pool accumulation -> channel scale.
# Grid = (batch, hw_tiles); hw axis is the reduction axis ("arbitrary").
# ---------------------------------------------------------------------------
def _se_pool_scale_kernel(x_ref, w1t_ref, b1_ref, w2t_ref, b2_ref, s_ref,
                          acc_ref, *, inv_hw, hw_total, hw_tile):
    j = pl.program_id(1)

    @pl.when(j == 0)
    def _():
        acc_ref[...] = jnp.zeros_like(acc_ref)

    x = x_ref[...].astype(jnp.float32)                                 # (1, C, T)
    if hw_total % hw_tile != 0:  # static check: mask the ragged last HW tile
        lane = jax.lax.broadcasted_iota(jnp.int32, x.shape, dimension=2)
        x = jnp.where(lane + j * hw_tile < hw_total, x, 0.0)
    acc_ref[...] += jnp.sum(x, axis=-1)                                # (1, C)

    @pl.when(j == pl.num_programs(1) - 1)
    def _():
        pooled = acc_ref[...] * inv_hw
        h = jnp.dot(pooled, w1t_ref[...], preferred_element_type=jnp.float32)
        h = jnp.maximum(h + b1_ref[...], 0.0)
        z = jnp.dot(h, w2t_ref[...], preferred_element_type=jnp.float32)
        z = z + b2_ref[...]
        s_ref[...] = jax.nn.sigmoid(z)[:, :, None]                     # (1, C, 1)


# ---------------------------------------------------------------------------
# Large-slab fallback, pass 2: HW-tiled channel rescale.
# ---------------------------------------------------------------------------
def _se_apply_kernel(x_ref, s_ref, o_ref):
    x = x_ref[...]                                                     # (1, C, T)
    s = s_ref[...].astype(x.dtype)                                     # (1, C, 1)
    o_ref[...] = (x * s).astype(o_ref.dtype)


def _choose_batch_tile(n, per_sample_bytes, target_block_bytes, min_grid_steps=4):
    """Largest batch tile keeping the x block <= target bytes, while leaving at
    least min(n, min_grid_steps) grid steps for megacore / pipeline overlap."""
    bt = max(1, min(n, target_block_bytes // max(per_sample_bytes, 1)))
    steps = min(n, min_grid_steps)
    if steps > 1:
        bt = min(bt, max(1, n // steps))
    return int(max(1, bt))


def _choose_hw_tile(hw, c_bytes, target_block_bytes):
    """Lane-aligned (multiple of 128) HW tile, or full HW when HW <= 128."""
    want = max(1, target_block_bytes // max(c_bytes, 1))
    want128 = max(128, (want // 128) * 128)
    if hw <= 128:
        return hw
    if hw % 128 == 0:
        return min(hw, want128)
    return min((hw // 128) * 128, want128)


# ---------------------------------------------------------------------------
# Wrapper: NCHW in / NCHW out, PyTorch parameter layout.
#   w1: (R, C)  b1: (R,)   -- Conv2d(C, R, 1)
#   w2: (C, R)  b2: (C,)   -- Conv2d(R, C, 1)
# ---------------------------------------------------------------------------
def se_block(x_nchw, w1, b1, w2, b2, *, target_block_bytes=2 << 20,
             max_fused_block_bytes=4 << 20):
    n, c, h, w = x_nchw.shape
    hw = h * w
    r = w1.shape[0]
    itemsize = jnp.dtype(x_nchw.dtype).itemsize
    per_sample = c * hw * itemsize
    inv_hw = 1.0 / float(hw)

    x2 = x_nchw.reshape(n, c, hw)        # free row-major reshape (no transpose)
    w1t = w1.T.astype(jnp.float32)       # (C, R)
    w2t = w2.T.astype(jnp.float32)       # (R, C)
    b1r = b1.reshape(1, r).astype(jnp.float32)
    b2r = b2.reshape(1, c).astype(jnp.float32)
    weight_bytes = 4 * (2 * c * r + r + c)

    # TODO(synk): when HW % 128 != 0 and C % 128 == 0 (late-stage 7x7/14x14
    # maps) flip the per-sample layout to (HW, C) so C is the lane axis; doing
    # so without an extra HBM pass needs an NHWC input or a fused transpose.

    if per_sample <= max_fused_block_bytes:
        # ---------------- fused single-pass path ---------------------------
        bt = _choose_batch_tile(n, per_sample, target_block_bytes)
        block_bytes = bt * per_sample
        needed = 4 * block_bytes + 2 * weight_bytes + (2 << 20)
        vmem_limit = int(min(max(needed, 32 << 20), 64 << 20))
        out = pl.pallas_call(
            partial(_se_fused_kernel, inv_hw=inv_hw),
            out_shape=jax.ShapeDtypeStruct((n, c, hw), x_nchw.dtype),
            grid=(pl.cdiv(n, bt),),
            in_specs=[
                pl.BlockSpec((bt, c, hw), lambda i: (i, 0, 0)),  # pipelined x
                pl.BlockSpec((c, r), lambda i: (0, 0)),          # resident weights
                pl.BlockSpec((1, r), lambda i: (0, 0)),
                pl.BlockSpec((r, c), lambda i: (0, 0)),
                pl.BlockSpec((1, c), lambda i: (0, 0)),
            ],
            out_specs=pl.BlockSpec((bt, c, hw), lambda i: (i, 0, 0)),
            input_output_aliases={0: 0},                         # in-place rescale
            compiler_params=pltpu.CompilerParams(
                dimension_semantics=("parallel",),
                vmem_limit_bytes=vmem_limit),
            cost_estimate=pl.CostEstimate(
                flops=int(2 * n * c * hw + 4 * n * c * r),
                transcendentals=int(n * c),
                bytes_accessed=int(2 * n * c * hw * itemsize + weight_bytes)),
        )(x2, w1t, b1r, w2t, b2r)
        return out.reshape(n, c, h, w)

    # ---------------- large-slab path: reduce-then-scale -------------------
    hw_tile = _choose_hw_tile(hw, c * itemsize, target_block_bytes)
    num_hw = pl.cdiv(hw, hw_tile)
    block_bytes = c * hw_tile * itemsize

    needed_pool = 2 * block_bytes + 2 * weight_bytes + 8 * c * 4 + (2 << 20)
    scale = pl.pallas_call(
        partial(_se_pool_scale_kernel, inv_hw=inv_hw, hw_total=hw,
                hw_tile=hw_tile),
        out_shape=jax.ShapeDtypeStruct((n, c, 1), jnp.float32),
        grid=(n, num_hw),
        in_specs=[
            pl.BlockSpec((1, c, hw_tile), lambda i, j: (i, 0, j)),
            pl.BlockSpec((c, r), lambda i, j: (0, 0)),
            pl.BlockSpec((1, r), lambda i, j: (0, 0)),
            pl.BlockSpec((r, c), lambda i, j: (0, 0)),
            pl.BlockSpec((1, c), lambda i, j: (0, 0)),
        ],
        out_specs=pl.BlockSpec((1, c, 1), lambda i, j: (i, 0, 0)),
        scratch_shapes=[pltpu.VMEM((1, c), jnp.float32)],
        compiler_params=pltpu.CompilerParams(
            dimension_semantics=("parallel", "arbitrary"),
            vmem_limit_bytes=int(min(max(needed_pool, 32 << 20), 64 << 20))),
    )(x2, w1t, b1r, w2t, b2r)

    needed_apply = 4 * block_bytes + 8 * c * 4 + (2 << 20)
    out = pl.pallas_call(
        _se_apply_kernel,
        out_shape=jax.ShapeDtypeStruct((n, c, hw), x_nchw.dtype),
        grid=(n, num_hw),
        in_specs=[
            pl.BlockSpec((1, c, hw_tile), lambda i, j: (i, 0, j)),
            pl.BlockSpec((1, c, 1), lambda i, j: (i, 0, 0)),
        ],
        out_specs=pl.BlockSpec((1, c, hw_tile), lambda i, j: (i, 0, j)),
        input_output_aliases={0: 0},
        compiler_params=pltpu.CompilerParams(
            dimension_semantics=("parallel", "parallel"),
            vmem_limit_bytes=int(min(max(needed_apply, 32 << 20), 64 << 20))),
    )(x2, scale)
    return out.reshape(n, c, h, w)


# ---------------------------------------------------------------------------
# Deterministic synthetic parameters matching the PyTorch module's shapes.
# ---------------------------------------------------------------------------
def init_se_params(key, channels):
    reduction = max(1, channels // 16)
    k1, k2, k3, k4 = jax.random.split(key, 4)
    w1 = jax.random.normal(k1, (reduction, channels), jnp.float32) * 0.1
    b1 = jax.random.normal(k2, (reduction,), jnp.float32) * 0.1
    w2 = jax.random.normal(k3, (channels, reduction), jnp.float32) * 0.1
    b2 = jax.random.normal(k4, (channels,), jnp.float32) * 0.1
    return w1, b1, w2, b2


if __name__ == "__main__":
    key = jax.random.PRNGKey(0)
    pkey, xkey = jax.random.split(key)

    N, C, H, W = 2, 128, 16, 16          # C=128 (R=8), HW=256 -> lane-dense
    w1, b1, w2, b2 = init_se_params(pkey, C)
    x = jax.random.normal(xkey, (N, C, H, W), jnp.float32)

    # Pure-JAX reference for correctness.
    pooled = jnp.mean(x, axis=(2, 3))                      # (N, C)
    h_ref = jnp.maximum(pooled @ w1.T + b1, 0.0)           # (N, R)
    s_ref = jax.nn.sigmoid(h_ref @ w2.T + b2)              # (N, C)
    ref = x * s_ref[:, :, None, None]

    # Fast fused path (batch-tiled single pass).
    fused = jax.jit(se_block)
    out_fused = jax.block_until_ready(fused(x, w1, b1, w2, b2))

    # Large-slab fallback path, forced here with a tiny block budget so the
    # HW-tiled reduce-then-scale pipeline is also exercised on TPU.
    tiled = jax.jit(partial(se_block, target_block_bytes=64 * 1024,
                            max_fused_block_bytes=64 * 1024))
    out_tiled = jax.block_until_ready(tiled(x, w1, b1, w2, b2))

    for out in (out_fused, out_tiled):
        assert out.shape == x.shape, out.shape
        assert bool(jnp.all(jnp.isfinite(out)))
        assert bool(jnp.allclose(out, ref, atol=1e-4, rtol=1e-4))
    print("KERNEL_OK")
</pallas_src>

<mosaic_0001>
module attributes {stable_mosaic.version = 11 : i64} {
  func.func @_se_fused_kernel(%arg0: i32, %arg1: memref<1x128x256xf32, #tpu.memory_space<vmem>>, %arg2: memref<128x8xf32, #tpu.memory_space<vmem>>, %arg3: memref<1x8xf32, #tpu.memory_space<vmem>>, %arg4: memref<8x128xf32, #tpu.memory_space<vmem>>, %arg5: memref<1x128xf32, #tpu.memory_space<vmem>>, %arg6: memref<1x128x256xf32, #tpu.memory_space<vmem>>) attributes {dimension_semantics = [#tpu.dimension_semantics<parallel>], iteration_bounds = array<i64: 2>, scalar_prefetch = 0 : i64, scratch_operands = 0 : i64, tpu.core_type = #tpu.core_type<tc>, window_params = [{transform_indices = @transform_0, window_bounds = array<i64: 1, 128, 256>}, {pipeline_mode = #tpu.pipeline_mode<synchronous>, transform_indices = @transform_1, window_bounds = array<i64: 128, 8>}, {pipeline_mode = #tpu.pipeline_mode<synchronous>, transform_indices = @transform_2, window_bounds = array<i64: 1, 8>}, {pipeline_mode = #tpu.pipeline_mode<synchronous>, transform_indices = @transform_3, window_bounds = array<i64: 8, 128>}, {pipeline_mode = #tpu.pipeline_mode<synchronous>, transform_indices = @transform_4, window_bounds = array<i64: 1, 128>}, {transform_indices = @transform_5, window_bounds = array<i64: 1, 128, 256>}]} {
    %c0 = arith.constant 0 : index
    %c0_0 = arith.constant 0 : index
    %c0_1 = arith.constant 0 : index
    %0 = vector.load %arg1[%c0, %c0_0, %c0_1] : memref<1x128x256xf32, #tpu.memory_space<vmem>>, vector<1x128x256xf32>
    %cst = arith.constant dense<0.000000e+00> : vector<1x128xf32>
    %1 = vector.multi_reduction <add>, %0, %cst [2] : vector<1x128x256xf32> to vector<1x128xf32>
    %cst_2 = arith.constant 3.906250e-03 : f32
    %2 = vector.broadcast %cst_2 : f32 to vector<1x128xf32>
    %3 = arith.mulf %1, %2 : vector<1x128xf32>
    %c0_3 = arith.constant 0 : index
    %c0_4 = arith.constant 0 : index
    %4 = vector.load %arg2[%c0_3, %c0_4] : memref<128x8xf32, #tpu.memory_space<vmem>>, vector<128x8xf32>
    %cst_5 = arith.constant dense<0.000000e+00> : vector<1x8xf32>
    %5 = tpu.matmul %3, %4, %cst_5 {dimension_numbers = #tpu.dot_dimension_numbers<[1], [0], [0], [1], [0, 0, 1, 1], [], []>} : vector<1x128xf32>, vector<128x8xf32>, vector<1x8xf32> -> vector<1x8xf32>
    %c0_6 = arith.constant 0 : index
    %c0_7 = arith.constant 0 : index
    %6 = vector.load %arg3[%c0_6, %c0_7] : memref<1x8xf32, #tpu.memory_space<vmem>>, vector<1x8xf32>
    %7 = arith.addf %5, %6 : vector<1x8xf32>
    %cst_8 = arith.constant 0.000000e+00 : f32
    %8 = vector.broadcast %cst_8 : f32 to vector<1x8xf32>
    %9 = arith.maximumf %7, %8 : vector<1x8xf32>
    %c0_9 = arith.constant 0 : index
    %c0_10 = arith.constant 0 : index
    %10 = vector.load %arg4[%c0_9, %c0_10] : memref<8x128xf32, #tpu.memory_space<vmem>>, vector<8x128xf32>
    %cst_11 = arith.constant dense<0.000000e+00> : vector<1x128xf32>
    %11 = tpu.matmul %9, %10, %cst_11 {dimension_numbers = #tpu.dot_dimension_numbers<[1], [0], [0], [1], [0, 0, 1, 1], [], []>} : vector<1x8xf32>, vector<8x128xf32>, vector<1x128xf32> -> vector<1x128xf32>
    %c0_12 = arith.constant 0 : index
    %c0_13 = arith.constant 0 : index
    %12 = vector.load %arg5[%c0_12, %c0_13] : memref<1x128xf32, #tpu.memory_space<vmem>>, vector<1x128xf32>
    %13 = arith.addf %11, %12 : vector<1x128xf32>
    %14 = arith.negf %13 : vector<1x128xf32>
    %15 = math.exp %14 : vector<1x128xf32>
    %cst_14 = arith.constant 1.000000e+00 : f32
    %16 = vector.broadcast %cst_14 : f32 to vector<1x128xf32>
    %17 = arith.addf %16, %15 : vector<1x128xf32>
    %18 = arith.divf %16, %17 : vector<1x128xf32>
    %19 = vector.shape_cast %18 : vector<1x128xf32> to vector<1x128x1xf32>
    %20 = vector.broadcast %19 : vector<1x128x1xf32> to vector<1x128x256xf32>
    %21 = arith.mulf %0, %20 : vector<1x128x256xf32>
    %c0_15 = arith.constant 0 : index
    %c0_16 = arith.constant 0 : index
    %c0_17 = arith.constant 0 : index
    %22 = vector.load %arg6[%c0_15, %c0_16, %c0_17] : memref<1x128x256xf32, #tpu.memory_space<vmem>>, vector<1x128x256xf32>
    tpu.vector_store %arg6[%c0_15, %c0_16, %c0_17], %21 {strides = array<i32>} : memref<1x128x256xf32, #tpu.memory_space<vmem>>, vector<1x128x256xf32>,
    return
  }
  func.func @transform_0(%arg0: i32) -> (i32, i32, i32) {
    %c0_i32 = arith.constant 0 : i32
    %c0_i32_0 = arith.constant 0 : i32
    %c0_i32_1 = arith.constant 0 : i32
    return %arg0, %c0_i32, %c0_i32_0 : i32, i32, i32
  }
  func.func @transform_1(%arg0: i32) -> (i32, i32) {
    %c0_i32 = arith.constant 0 : i32
    %c0_i32_0 = arith.constant 0 : i32
    %c0_i32_1 = arith.constant 0 : i32
    return %c0_i32, %c0_i32_0 : i32, i32
  }
  func.func @transform_2(%arg0: i32) -> (i32, i32) {
    %c0_i32 = arith.constant 0 : i32
    %c0_i32_0 = arith.constant 0 : i32
    %c0_i32_1 = arith.constant 0 : i32
    return %c0_i32, %c0_i32_0 : i32, i32
  }
  func.func @transform_3(%arg0: i32) -> (i32, i32) {
    %c0_i32 = arith.constant 0 : i32
    %c0_i32_0 = arith.constant 0 : i32
    %c0_i32_1 = arith.constant 0 : i32
    return %c0_i32, %c0_i32_0 : i32, i32
  }
  func.func @transform_4(%arg0: i32) -> (i32, i32) {
    %c0_i32 = arith.constant 0 : i32
    %c0_i32_0 = arith.constant 0 : i32
    %c0_i32_1 = arith.constant 0 : i32
    return %c0_i32, %c0_i32_0 : i32, i32
  }
  func.func @transform_5(%arg0: i32) -> (i32, i32, i32) {
    %c0_i32 = arith.constant 0 : i32
    %c0_i32_0 = arith.constant 0 : i32
    %c0_i32_1 = arith.constant 0 : i32
    return %arg0, %c0_i32, %c0_i32_0 : i32, i32, i32
  }
}

</mosaic_0001>

<bundles_post_ra>
// kernel: se_block.1
= control target key start
LH: loop header
LB: loop body
LE: loop exit
PB: predicated region body
PF: predicated region fallthrough
CT: control target
= control target key end

     0   :  { %s782_s18 = smov 0   ;;  %s1097_s0 = inlined_call_operand.vmem [shape: f32[2,128,256], index: 0, kind: input, shape index: {}, may-alias: {0,5}]   ;;  %s1098_s1 = inlined_call_operand.vmem [shape: f32[128,8], index: 1, kind: input, shape index: {}]   ;;  %s1099_s2 = inlined_call_operand.vmem [shape: f32[1,8], index: 2, kind: input, shape index: {}]   ;;  %s1100_s3 = inlined_call_operand.vmem [shape: f32[8,128], index: 3, kind: input, shape index: {}]   ;;  %s1101_s4 = inlined_call_operand.vmem [shape: f32[1,128], index: 4, kind: input, shape index: {}]   ;;  %s1102_s5 = inlined_call_operand.vmem [shape: f32[2,128,256], index: 5, kind: output, shape index: {}, may-alias: {0,5}]  }
   0x1 LB: > { %s700_s19 = sadd.s32 4294967295, %s750_s18   ;;  %p704_p0 = scmp.ge.s32.totalorder %s750_s18, 1  ;;  %s750_s18 = sphi %s782_s18, %s15_s18  }
   0x2   : > { %p187_p1 = scmp.lt.s32.totalorder %s750_s18, 3 }
   0x4   : > { %p188_p2 = pnand %p704_p0, %p187_p1 }
   0x5   : > { %p215_p3 = scmp.lt.s32.totalorder (!%p188_p2), %s700_s19, 1 }
   0x6   : > { %191 = sbr.rel (%p188_p2) target bundleno = 666 (0x29a), region = 40 }
   0xb   : > { %s1104_s19 = smov (!%p215_p3, %s700_s19), 1  ;;  %v336_v48 = vld [vmem:[%s1098_s1 + $0x78] sm:$0xff]  ;;  %v335_v49 = vld [vmem:[%s1098_s1 + $0x70] sm:$0xff]  ;;  %v334_v50 = vld [vmem:[%s1098_s1 + $0x68] sm:$0xff]  ;;  %v354_v59 = vlaneseq  ;;  %vm359_vm0 = vcmask 130112   ;;  %vm363_vm1 = vcmask 195712  }
   0xc   : > { %s713_s20 = sshll.u32 %s1104_s19, 8  ;;  %418 = vmatpush.msra.mxu0 %v336_v48  ;;  %v333_v51 = vld [vmem:[%s1098_s1 + $0x60] sm:$0xff]  ;;  %v332_v52 = vld [vmem:[%s1098_s1 + $0x58] sm:$0xff]  ;;  %v331_v53 = vld [vmem:[%s1098_s1 + $0x50] sm:$0xff]  ;;  %vm367_vm2 = vcmask 261312   ;;  %vm371_vm3 = vcmask 326912  }
   0xd   : > { %s798_s23 = scalar_lea.vmem %s1097_s0, %s713_s20  ;;  %v330_v54 = vld [vmem:[%s1098_s1 + $0x48] sm:$0xff]  ;;  %v329_v55 = vld [vmem:[%s1098_s1 + $0x40] sm:$0xff]  ;;  %v328_v56 = vld [vmem:[%s1098_s1 + $0x38] sm:$0xff]  ;;  %vm375_vm4 = vcmask 392512   ;;  %vm379_vm5 = vcmask 458112   ;;  %vm383_vm6 = vcmask 523712   ;;  %s1028_s17 = scalar_lea.vmem %s1102_s5, %s713_s20 }
   0xe   : > { %v801_v0 = vld [vmem:[%s798_s23] sm:$0xff]  ;;  %v804_v1 = vld [vmem:[%s798_s23 + $0x8] sm:$0xff]  ;;  %v825_v9 = vld [vmem:[%s798_s23 + $0x10] sm:$0xff]  ;;  %419 = vmatpush.msra.mxu0 %v335_v49  ;;  %vm387_vm7 = vcmask 589312   ;;  %vm391_vm8 = vcmask 654912   ;;  %vm395_vm9 = vcmask 720512  }
   0xf   : > { %v807_v2 = vld [vmem:[%s798_s23 + $0x20] sm:$0xff]  ;;  %v257_v3 = vadd.f32 %v804_v1, %v801_v0  ;;  %v812_v4 = vld [vmem:[%s798_s23 + $0x28] sm:$0xff]  ;;  %v828_v10 = vld [vmem:[%s798_s23 + $0x18] sm:$0xff]  ;;  %vm399_vm10 = vcmask 786112   ;;  %vm403_vm11 = vcmask 851712   ;;  %vm407_vm12 = vcmask 917312  }
  0x10   : > { %v815_v5 = vld [vmem:[%s798_s23 + $0x40] sm:$0xff]  ;;  %v818_v6 = vld [vmem:[%s798_s23 + $0x48] sm:$0xff]  ;;  %v263_v7 = vadd.f32 %v812_v4, %v807_v2  ;;  %v831_v11 = vld [vmem:[%s798_s23 + $0x30] sm:$0xff]  ;;  %v260_v15 = vadd.f32 %v828_v10, %v825_v9  ;;  %420 = vmatpush.msra.mxu0 %v334_v50  ;;  %vm411_vm13 = vcmask 982912   ;;  %vm415_vm14 = vcmask 1048512  }
  0x11   : > { %v269_v8 = vadd.f32 %v818_v6, %v815_v5  ;;  %258 = vadd.xlane.f32.xlu0 %v257_v3  ;;  %v834_v12 = vld [vmem:[%s798_s23 + $0x38] sm:$0xff]  ;;  %v837_v13 = vld [vmem:[%s798_s23 + $0x50] sm:$0xff]  ;;  %v849_v18 = vld [vmem:[%s798_s23 + $0x60] sm:$0xff]  ;;  %v965_v3 = vand.u32 127, %v354_v59  ;;  %vm441_vm15 = vcmask 64512  }
  0x12   : > { %264 = vadd.xlane.f32.xlu1 %v263_v7  ;;  %v840_v14 = vld [vmem:[%s798_s23 + $0x58] sm:$0xff]  ;;  %v266_v16 = vadd.f32 %v834_v12, %v831_v11  ;;  %v852_v19 = vld [vmem:[%s798_s23 + $0x68] sm:$0xff]  ;;  %v855_v20 = vld [vmem:[%s798_s23 + $0x70] sm:$0xff]  ;;  %421 = vmatpush.msra.mxu0 %v333_v51 }
  0x13   : > { %270 = vadd.xlane.f32.xlu2 %v269_v8  ;;  %v272_v17 = vadd.f32 %v840_v14, %v837_v13  ;;  %v858_v21 = vld [vmem:[%s798_s23 + $0x78] sm:$0xff]  ;;  %v861_v22 = vld [vmem:[%s798_s23 + $0x80] sm:$0xff]  ;;  %v864_v23 = vld [vmem:[%s798_s23 + $0x88] sm:$0xff]  ;;  %v275_v24 = vadd.f32 %v852_v19, %v849_v18 }
  0x14   : > { %v278_v25 = vadd.f32 %v858_v21, %v855_v20  ;;  %v281_v26 = vadd.f32 %v864_v23, %v861_v22  ;;  %v873_v27 = vld [vmem:[%s798_s23 + $0x90] sm:$0xff]  ;;  %v876_v28 = vld [vmem:[%s798_s23 + $0x98] sm:$0xff]  ;;  %v879_v29 = vld [vmem:[%s798_s23 + $0xa0] sm:$0xff]  ;;  %422 = vmatpush.msra.mxu0 %v332_v52  ;;  %v369_v52 = vadd.s32 4294967264, %v965_v3 }
  0x15   : > { %v882_v30 = vld [vmem:[%s798_s23 + $0xa8] sm:$0xff]  ;;  %v885_v31 = vld [vmem:[%s798_s23 + $0xb0] sm:$0xff]  ;;  %v888_v32 = vld [vmem:[%s798_s23 + $0xb8] sm:$0xff]  ;;  %v284_v33 = vadd.f32 %v876_v28, %v873_v27 }
  0x16   : > { %v287_v34 = vadd.f32 %v882_v30, %v879_v29  ;;  %v290_v35 = vadd.f32 %v888_v32, %v885_v31  ;;  %v897_v36 = vld [vmem:[%s798_s23 + $0xc0] sm:$0xff]  ;;  %v900_v37 = vld [vmem:[%s798_s23 + $0xc8] sm:$0xff]  ;;  %v903_v38 = vld [vmem:[%s798_s23 + $0xd0] sm:$0xff]  ;;  %423 = vmatpush.msra.mxu0 %v331_v53 }
  0x17   : > { %v906_v39 = vld [vmem:[%s798_s23 + $0xd8] sm:$0xff]  ;;  %v909_v40 = vld [vmem:[%s798_s23 + $0xe0] sm:$0xff]  ;;  %v912_v41 = vld [vmem:[%s798_s23 + $0xe8] sm:$0xff]  ;;  %v293_v42 = vadd.f32 %v900_v37, %v897_v36 }
  0x18   : > { %v296_v43 = vadd.f32 %v906_v39, %v903_v38  ;;  %v299_v44 = vadd.f32 %v912_v41, %v909_v40  ;;  %v921_v45 = vld [vmem:[%s798_s23 + $0xf0] sm:$0xff]  ;;  %v924_v46 = vld [vmem:[%s798_s23 + $0xf8] sm:$0xff]  ;;  %424 = vmatpush.msra.mxu0 %v330_v54  ;;  %v326_v62 = vld [vmem:[%s1098_s1 + $0x28] sm:$0xff] }
  0x19   : > { %261 = vadd.xlane.f32.xlu0 %v260_v15  ;;  %v302_v47 = vadd.f32 %v924_v46, %v921_v45  ;;  %v327_v58 = vld [vmem:[%s1098_s1 + $0x30] sm:$0xff]  ;;  %v325_v63 = vld [vmem:[%s1098_s1 + $0x20] sm:$0xff]  ;;  %v324_v7 = vld [vmem:[%s1098_s1 + $0x18] sm:$0xff]  ;;  %v357_v15 = vadd.s32 4294967288, %v965_v3 }
  0x1a   : > { %267 = vadd.xlane.f32.xlu1 %v266_v16  ;;  %425 = vmatpush.msra.mxu0 %v329_v55  ;;  %v361_v16 = vadd.s32 4294967280, %v965_v3  ;;  %v321_v48 = vld [vmem:[%s1098_s1] sm:$0xff]  ;;  %v373_v55 = vadd.s32 4294967256, %v965_v3 }
  0x1b   : > { %273 = vadd.xlane.f32.xlu2 %v272_v17 }
  0x1c   : > { %426 = vmatpush.msra.mxu0 %v328_v56 }
  0x1e   : > { %427 = vmatpush.msra.mxu0 %v327_v58 }
  0x20   : > { %428 = vmatpush.msra.mxu0 %v326_v62 }
  0x21   : > { %276 = vadd.xlane.f32.xlu0 %v275_v24 }
  0x22   : > { %279 = vadd.xlane.f32.xlu1 %v278_v25  ;;  %429 = vmatpush.msra.mxu0 %v325_v63  ;;  %v323_v25 = vld [vmem:[%s1098_s1 + $0x10] sm:$0xff] }
  0x23   : > { %282 = vadd.xlane.f32.xlu2 %v281_v26 }
  0x24   : > { %430 = vmatpush.msra.mxu0 %v324_v7 }
  0x26   : > { %431 = vmatpush.msra.mxu0 %v323_v25  ;;  %v385_v25 = vadd.s32 4294967232, %v965_v3 }
  0x29   : > { %285 = vadd.xlane.f32.xlu0 %v284_v33  ;;  %v365_v33 = vadd.s32 4294967272, %v965_v3 }
  0x2a   : > { %288 = vadd.xlane.f32.xlu1 %v287_v34 }
  0x2b   : > { %291 = vadd.xlane.f32.xlu2 %v290_v35 }
  0x31   : > { %294 = vadd.xlane.f32.xlu0 %v293_v42 }
  0x32   : > { %297 = vadd.xlane.f32.xlu1 %v296_v43  ;;  %v322_v43 = vld [vmem:[%s1098_s1 + $0x8] sm:$0xff] }
  0x33   : > { %300 = vadd.xlane.f32.xlu2 %v299_v44  ;;  %432 = vmatpush.msra.mxu0 %v322_v43 }
  0x35   : > { %433 = vmatpush.msra.mxu0 %v321_v48 }
  0x39   : > { %303 = vadd.xlane.f32.xlu0 %v302_v47 }
  0x84   : > { %v259_v57 = vpop.xlane.xlu0 %258 }
  0x85   : > { %v265_v60 = vpop.xlane.xlu1 %264  ;;  %v305_v8 = vmul.f32 0.00390625, %v259_v57  ;;  %v377_v57 = vadd.s32 4294967248, %v965_v3 }
  0x86   : > { %v271_v61 = vpop.xlane.xlu2 %270  ;;  %v307_v17 = vmul.f32 0.00390625, %v265_v60 }
  0x87   : > { %v356_v44 = vperm.slane %v305_v8, %v965_v3  ;;  %v309_v53 = vmul.f32 0.00390625, %v271_v61 }
  0x88   : > { %v362_v49 = vperm.slane %v307_v17, %v361_v16  ;;  %v381_v16 = vadd.s32 4294967240, %v965_v3 }
  0x89   : > { %v370_v8 = vperm.slane %v309_v53, %v369_v52 }
  0x8c   : > { %v262_v24 = vpop.xlane.xlu0 %261 }
  0x8d   : > { %v306_v26 = vmul.f32 0.00390625, %v262_v24  ;;  %v268_v34 = vpop.xlane.xlu1 %267 }
  0x8e   : > { %v274_v35 = vpop.xlane.xlu2 %273  ;;  %v308_v42 = vmul.f32 0.00390625, %v268_v34 }
  0x8f   : > { %v358_v47 = vperm.slane %v306_v26, %v357_v15  ;;  %v310_v56 = vmul.f32 0.00390625, %v274_v35  ;;  %v389_v35 = vadd.s32 4294967224, %v965_v3 }
  0x90   : > { %v366_v51 = vperm.slane %v308_v42, %v365_v33 }
  0x91   : > { %v360_v50 = vsel %vm359_vm0, %v358_v47, %v356_v44  ;;  %v374_v15 = vperm.slane %v310_v56, %v373_v55 }
  0x92   : > { %v364_v54 = vsel %vm363_vm1, %v362_v49, %v360_v50  ;;  %v393_v50 = vadd.s32 4294967216, %v965_v3 }
  0x93   : > { %v368_v60 = vsel %vm367_vm2, %v366_v51, %v364_v54  ;;  %v397_v54 = vadd.s32 4294967208, %v965_v3 }
  0x94   : > { %v277_v58 = vpop.xlane.xlu0 %276  ;;  %v372_v61 = vsel %vm371_vm3, %v370_v8, %v368_v60  ;;  %v401_v60 = vadd.s32 4294967200, %v965_v3  ;;  %v405_v8 = vadd.s32 4294967192, %v965_v3 }
  0x95   : > { %v311_v62 = vmul.f32 0.00390625, %v277_v58  ;;  %v280_v63 = vpop.xlane.xlu1 %279  ;;  %v376_v33 = vsel %vm375_vm4, %v374_v15, %v372_v61 }
  0x96   : > { %v283_v7 = vpop.xlane.xlu2 %282  ;;  %v312_v17 = vmul.f32 0.00390625, %v280_v63 }
  0x97   : > { %v378_v24 = vperm.slane %v311_v62, %v377_v57  ;;  %v313_v26 = vmul.f32 0.00390625, %v283_v7 }
  0x98   : > { %v382_v34 = vperm.slane %v312_v17, %v381_v16 }
  0x99   : > { %v380_v42 = vsel %vm379_vm5, %v378_v24, %v376_v33  ;;  %v386_v49 = vperm.slane %v313_v26, %v385_v25  ;;  %v409_v25 = vadd.s32 4294967184, %v965_v3 }
  0x9a   : > { %v384_v52 = vsel %vm383_vm6, %v382_v34, %v380_v42  ;;  %v413_v42 = vadd.s32 4294967176, %v965_v3 }
  0x9b   : > { %v388_v56 = vsel %vm387_vm7, %v386_v49, %v384_v52  ;;  %v439_v52 = vld [vmem:[%s1100_s3] sm:$0xff] }
  0x9c   : > { %v286_v43 = vpop.xlane.xlu0 %285  ;;  %460 = vmatpush.msra.mxu1 %v439_v52 }
  0x9d   : > { %v314_v44 = vmul.f32 0.00390625, %v286_v43  ;;  %v289_v47 = vpop.xlane.xlu1 %288 }
  0x9e   : > { %v292_v48 = vpop.xlane.xlu2 %291  ;;  %v315_v51 = vmul.f32 0.00390625, %v289_v47 }
  0x9f   : > { %v390_v53 = vperm.slane %v314_v44, %v389_v35  ;;  %v316_v55 = vmul.f32 0.00390625, %v292_v48 }
  0xa0   : > { %v394_v57 = vperm.slane %v315_v51, %v393_v50 }
  0xa1   : > { %v392_v58 = vsel %vm391_vm8, %v390_v53, %v388_v56  ;;  %v398_v63 = vperm.slane %v316_v55, %v397_v54  ;;  %v337_v53 = vld [vmem:[%s1099_s2] sm:$0x1]  ;;  %v1002_v56 = vshrl.u32 %v354_v59, 7 }
  0xa2   : > { %v396_v17 = vsel %vm395_vm9, %v394_v57, %v392_v58 }
  0xa3   : > { %v400_v33 = vsel %vm399_vm10, %v398_v63, %v396_v17  ;;  %723 = vset.pattern.permute.xlu1 %v1002_v56  ;;  %v499_v57 = vadd.s32 16, %v1002_v56  ;;  %v493_v58 = vadd.s32 8, %v1002_v56  ;;  %v535_v52 = vadd.s32 64, %v1002_v56 }
  0xa4   : > { %v295_v62 = vpop.xlane.xlu0 %294 }
  0xa5   : > { %v317_v7 = vmul.f32 0.00390625, %v295_v62  ;;  %v298_v15 = vpop.xlane.xlu1 %297  ;;  %725 = vset.pattern.permute.xlu0 %v499_v57  ;;  %724 = vset.pattern.permute.xlu2 %v493_v58  ;;  %v565_v57 = vadd.s32 104, %v1002_v56 }
  0xa6   : > { %v301_v16 = vpop.xlane.xlu2 %300  ;;  %v318_v61 = vmul.f32 0.00390625, %v298_v15 }
  0xa7   : > { %v402_v24 = vperm.slane %v317_v7, %v401_v60  ;;  %v319_v26 = vmul.f32 0.00390625, %v301_v16  ;;  %v440_v60 = vld [vmem:[%s1101_s4] sm:$0x1] }
  0xa8   : > { %v406_v34 = vperm.slane %v318_v61, %v405_v8 }
  0xa9   : > { %v404_v35 = vsel %vm403_vm11, %v402_v24, %v400_v33  ;;  %v410_v43 = vperm.slane %v319_v26, %v409_v25 }
  0xaa   : > { %v408_v48 = vsel %vm407_vm12, %v406_v34, %v404_v35 }
  0xab   : > { %v412_v50 = vsel %vm411_vm13, %v410_v43, %v408_v48  ;;  %v541_v43 = vadd.s32 72, %v1002_v56  ;;  %v571_v48 = vadd.s32 112, %v1002_v56 }
  0xac   : > { %v304_v44 = vpop.xlane.xlu0 %303 }
  0xad   : > { %v320_v47 = vmul.f32 0.00390625, %v304_v44  ;;  %v505_v44 = vadd.s32 24, %v1002_v56 }
  0xaf   : > { %v414_v49 = vperm.slane %v320_v47, %v413_v42  ;;  %v511_v47 = vadd.s32 32, %v1002_v56 }
  0xb1   : > { %v416_v51 = vsel %vm415_vm14, %v414_v49, %v412_v50  ;;  %v517_v49 = vadd.s32 40, %v1002_v56  ;;  %v523_v50 = vadd.s32 48, %v1002_v56 }
  0xb2   : > { %434 = vmatmul.f32.vlgmr.msra.gmra.mxu0 %v416_v51  ;;  %v529_v51 = vadd.s32 56, %v1002_v56 }
 0x12f   : > { %v435_v3 = vpop.f32.mrf.mxu0 }
 0x130   : > { %v436_v54 = vadd.f32 %v435_v3, %v337_v53  ;;  %v577_v53 = vadd.s32 120, %v1002_v56  ;;  %v547_v3 = vadd.s32 80, %v1002_v56 }
 0x132   : > { %v438_v55 = vmax.f32 %v436_v54, 0.0  ;;  %v553_v54 = vadd.s32 88, %v1002_v56 }
 0x134   : > { %709 = vmatmul.msk.f32.vlgmr.msra.gmra.mxu1 %vm441_vm15, %v438_v55  ;;  %v559_v55 = vadd.s32 96, %v1002_v56 }
 0x1b1   : > { %v462_v62 = vpop.f32.mrf.mxu1 }
 0x1b2   : > { %v463_v63 = vadd.f32 %v462_v62, %v440_v60 }
 0x1b4   : > { %v710_v7 = vmul.f32 -1.442695, %v463_v63 }
 0x1b6   : > { %740 = vpow2.f32 %v710_v7 }
 0x1bc   : > { %v741_v8 = vpop.eup %740 }
 0x1bd   : > { %v468_v15 = vadd.f32 1.0, %v741_v8 }
 0x1bf   : > { %742 = vrcp.f32 %v468_v15  ;;  %v480_v61 = vand.u32 2147483648, %v468_v15  ;;  %v478_v25 = vand.u32 2147483647, %v468_v15  ;;  %vm474_vm1 = vweird.f32 %v468_v15 }
 0x1c1   : > { %v481_v33 = vor.u32 1.1754944e-38, %v480_v61  ;;  %vm479_vm3 = vcmp.eq.f32.partialorder %v478_v25, 8.507059e+37 }
 0x1c5   : > { %v743_v59 = vpop.eup %742 }
 0x1c6   : > { %v470_v16 = vmul.f32 %v743_v59, %v468_v15  ;;  %vm475_vm0 = vweird.f32 %v743_v59 }
 0x1c7   : > { %vm476_vm2 = vmor %vm474_vm1, %vm475_vm0 }
 0x1c8   : > { %v471_v17 = vsub.f32 1.0, %v470_v16 }
 0x1ca   : > { %v472_v24 = vmul.f32 %v743_v59, %v471_v17 }
 0x1cc   : > { %v473_v26 = vadd.f32 %v743_v59, %v472_v24 }
 0x1ce   : > { %v477_v34 = vsel %vm476_vm2, %v743_v59, %v473_v26 }
 0x1cf   : > { %v482_v35 = vsel %vm479_vm3, %v481_v33, %v477_v34 }
 0x1d0   : > { %v484_v42 = vperm.slane %v482_v35, 0 }
 0x1d2   : > { %501 = vperm.xlu0 %725, %v484_v42   ;;  %495 = vperm.xlu2 %724, %v484_v42  }
 0x1d3   : > { %489 = vperm.xlu1 %723, %v484_v42  }
 0x1da   : > { %732 = vset.pattern.permute.xlu0 %v541_v43  ;;  %726 = vset.pattern.permute.xlu2 %v505_v44 }
 0x1db   : > { %727 = vset.pattern.permute.xlu1 %v511_v47 }
 0x1e2   : > { %543 = vperm.xlu0 %732, %v484_v42   ;;  %507 = vperm.xlu2 %726, %v484_v42  }
 0x1e3   : > { %513 = vperm.xlu1 %727, %v484_v42  }
 0x1ea   : > { %737 = vset.pattern.permute.xlu0 %v571_v48  ;;  %728 = vset.pattern.permute.xlu2 %v517_v49 }
 0x1eb   : > { %729 = vset.pattern.permute.xlu1 %v523_v50 }
 0x1f2   : > { %573 = vperm.xlu0 %737, %v484_v42   ;;  %519 = vperm.xlu2 %728, %v484_v42  }
 0x1f3   : > { %525 = vperm.xlu1 %729, %v484_v42  }
 0x1fa   : > { %730 = vset.pattern.permute.xlu2 %v529_v51  ;;  %739 = vset.pattern.permute.xlu0 %v577_v53 }
 0x1fb   : > { %731 = vset.pattern.permute.xlu1 %v535_v52 }
 0x202   : > { %531 = vperm.xlu2 %730, %v484_v42  }
 0x203   : > { %537 = vperm.xlu1 %731, %v484_v42  }
 0x20a   : > { %733 = vset.pattern.permute.xlu2 %v547_v3 }
 0x20b   : > { %734 = vset.pattern.permute.xlu1 %v553_v54 }
 0x212   : > { %549 = vperm.xlu2 %733, %v484_v42  }
 0x213   : > { %555 = vperm.xlu1 %734, %v484_v42  }
 0x21a   : > { %735 = vset.pattern.permute.xlu2 %v559_v55 }
 0x21b   : > { %736 = vset.pattern.permute.xlu1 %v565_v57 }
 0x222   : > { %561 = vperm.xlu2 %735, %v484_v42  }
 0x223   : > { %567 = vperm.xlu1 %736, %v484_v42  }
 0x22a   : > { %738 = vset.pattern.permute.xlu2 %v577_v53 }
 0x22c   : > { %v496_v58 = vpop.permute.xlu2 %495 }
 0x22d   : > { %v583_v60 = vmul.f32 %v496_v58, %v825_v9  ;;  %v584_v56 = vmul.f32 %v496_v58, %v828_v10 }
 0x22f   : > { %615 = vst [vmem:[%s1028_s17 + $0x10] sm:$0xff] %v583_v60 }
 0x230   : > { %616 = vst [vmem:[%s1028_s17 + $0x18] sm:$0xff] %v584_v56 }
 0x232   : > { %579 = vperm.xlu2 %738, %v484_v42  }
 0x23c   : > { %v508_v62 = vpop.permute.xlu2 %507 }
 0x23d   : > { %v587_v63 = vmul.f32 %v508_v62, %v831_v11  ;;  %v588_v7 = vmul.f32 %v508_v62, %v834_v12 }
 0x23f   : > { %619 = vst [vmem:[%s1028_s17 + $0x30] sm:$0xff] %v587_v63 }
 0x240   : > { %620 = vst [vmem:[%s1028_s17 + $0x38] sm:$0xff] %v588_v7 }
 0x244   : > { %v502_v8 = vpop.permute.xlu0 %501 }
 0x245   : > { %v585_v9 = vmul.f32 %v502_v8, %v807_v2  ;;  %v586_v10 = vmul.f32 %v502_v8, %v812_v4  ;;  %v490_v15 = vpop.permute.xlu1 %489 }
 0x246   : > { %v581_v59 = vmul.f32 %v490_v15, %v801_v0  ;;  %v582_v16 = vmul.f32 %v490_v15, %v804_v1 }
 0x247   : > { %617 = vst [vmem:[%s1028_s17 + $0x20] sm:$0xff] %v585_v9 }
 0x248   : > { %618 = vst [vmem:[%s1028_s17 + $0x28] sm:$0xff] %v586_v10 }
 0x249   : > { %613 = vst [vmem:[%s1028_s17] sm:$0xff] %v581_v59 }
 0x24a   : > { %614 = vst [vmem:[%s1028_s17 + $0x8] sm:$0xff] %v582_v16 }
 0x24c   : > { %v520_v11 = vpop.permute.xlu2 %519 }
 0x24d   : > { %v591_v12 = vmul.f32 %v520_v11, %v837_v13  ;;  %v592_v2 = vmul.f32 %v520_v11, %v840_v14 }
 0x24f   : > { %623 = vst [vmem:[%s1028_s17 + $0x50] sm:$0xff] %v591_v12 }
 0x250   : > { %624 = vst [vmem:[%s1028_s17 + $0x58] sm:$0xff] %v592_v2 }
 0x254   : > { %v544_v0 = vpop.permute.xlu0 %543 }
 0x255   : > { %v599_v1 = vmul.f32 %v544_v0, %v873_v27  ;;  %v600_v4 = vmul.f32 %v544_v0, %v876_v28  ;;  %v514_v17 = vpop.permute.xlu1 %513 }
 0x256   : > { %v589_v61 = vmul.f32 %v514_v17, %v815_v5  ;;  %v590_v24 = vmul.f32 %v514_v17, %v818_v6 }
 0x257   : > { %631 = vst [vmem:[%s1028_s17 + $0x90] sm:$0xff] %v599_v1 }
 0x258   : > { %632 = vst [vmem:[%s1028_s17 + $0x98] sm:$0xff] %v600_v4 }
 0x259   : > { %621 = vst [vmem:[%s1028_s17 + $0x40] sm:$0xff] %v589_v61 }
 0x25a   : > { %622 = vst [vmem:[%s1028_s17 + $0x48] sm:$0xff] %v590_v24 }
 0x25c   : > { %v532_v13 = vpop.permute.xlu2 %531 }
 0x25d   : > { %v595_v14 = vmul.f32 %v532_v13, %v855_v20  ;;  %v596_v27 = vmul.f32 %v532_v13, %v858_v21 }
 0x25f   : > { %627 = vst [vmem:[%s1028_s17 + $0x70] sm:$0xff] %v595_v14 }
 0x260   : > { %628 = vst [vmem:[%s1028_s17 + $0x78] sm:$0xff] %v596_v27 }
 0x264   : > { %v574_v5 = vpop.permute.xlu0 %573 }
 0x265   : > { %v609_v6 = vmul.f32 %v574_v5, %v909_v40  ;;  %v610_v28 = vmul.f32 %v574_v5, %v912_v41  ;;  %v526_v25 = vpop.permute.xlu1 %525 }
 0x266   : > { %v593_v26 = vmul.f32 %v526_v25, %v849_v18  ;;  %v594_v33 = vmul.f32 %v526_v25, %v852_v19 }
 0x267   : > { %641 = vst [vmem:[%s1028_s17 + $0xe0] sm:$0xff] %v609_v6 }
 0x268   : > { %642 = vst [vmem:[%s1028_s17 + $0xe8] sm:$0xff] %v610_v28 }
 0x269   : > { %625 = vst [vmem:[%s1028_s17 + $0x60] sm:$0xff] %v593_v26 }
 0x26a   : > { %626 = vst [vmem:[%s1028_s17 + $0x68] sm:$0xff] %v594_v33 }
 0x26c   : > { %v550_v20 = vpop.permute.xlu2 %549 }
 0x26d   : > { %v601_v21 = vmul.f32 %v550_v20, %v879_v29  ;;  %v602_v40 = vmul.f32 %v550_v20, %v882_v30 }
 0x26f   : > { %633 = vst [vmem:[%s1028_s17 + $0xa0] sm:$0xff] %v601_v21 }
 0x270   : > { %634 = vst [vmem:[%s1028_s17 + $0xa8] sm:$0xff] %v602_v40 }
 0x275   : > { %v538_v41 = vpop.permute.xlu1 %537 }
 0x276   : > { %v597_v18 = vmul.f32 %v538_v41, %v861_v22  ;;  %v598_v19 = vmul.f32 %v538_v41, %v864_v23 }
 0x278   : > { %629 = vst [vmem:[%s1028_s17 + $0x80] sm:$0xff] %v597_v18 }
 0x279   : > { %630 = vst [vmem:[%s1028_s17 + $0x88] sm:$0xff] %v598_v19 }
 0x27c   : > { %v562_v34 = vpop.permute.xlu2 %561 }
 0x27d   : > { %v605_v35 = vmul.f32 %v562_v34, %v897_v36  ;;  %v606_v29 = vmul.f32 %v562_v34, %v900_v37 }
 0x27f   : > { %637 = vst [vmem:[%s1028_s17 + $0xc0] sm:$0xff] %v605_v35 }
 0x280   : > { %638 = vst [vmem:[%s1028_s17 + $0xc8] sm:$0xff] %v606_v29 }
 0x285   : > { %v556_v30 = vpop.permute.xlu1 %555 }
 0x286   : > { %v603_v42 = vmul.f32 %v556_v30, %v885_v31  ;;  %v604_v22 = vmul.f32 %v556_v30, %v888_v32 }
 0x288   : > { %635 = vst [vmem:[%s1028_s17 + $0xb0] sm:$0xff] %v603_v42 }
 0x289   : > { %636 = vst [vmem:[%s1028_s17 + $0xb8] sm:$0xff] %v604_v22 }
 0x28c   : > { %v580_v23 = vpop.permute.xlu2 %579 }
 0x28d   : > { %v611_v43 = vmul.f32 %v580_v23, %v921_v45  ;;  %v612_v44 = vmul.f32 %v580_v23, %v924_v46 }
 0x28f   : > { %643 = vst [vmem:[%s1028_s17 + $0xf0] sm:$0xff] %v611_v43 }
 0x290   : > { %644 = vst [vmem:[%s1028_s17 + $0xf8] sm:$0xff] %v612_v44 }
 0x295   : > { %v568_v36 = vpop.permute.xlu1 %567 }
 0x296   : > { %v607_v37 = vmul.f32 %v568_v36, %v903_v38  ;;  %v608_v47 = vmul.f32 %v568_v36, %v906_v39 }
 0x298   : > { %639 = vst [vmem:[%s1028_s17 + $0xd0] sm:$0xff] %v607_v37 }
 0x299   : > { %640 = vst [vmem:[%s1028_s17 + $0xd8] sm:$0xff] %v608_v47 }
 0x29a PF: > { %s15_s18 = sadd.s32 1, %s750_s18  }
 0x29b   : > { %p12_p4 = scmp.ge.s32.totalorder %s15_s18, 4  }
 0x29d   :  { %14 = sbr.rel (!%p12_p4) target bundleno = 1 (0x1), region = 70 }

</bundles_post_ra>
